<compile_context>
chip_gen: v7x
topology: tpu7x:2x2x1
jax: 0.10.0
libtpu: 0.0.40
codegen_flags: <defaults>
</compile_context>

<pallas_src>
import functools
import math

import jax
import jax.numpy as jnp
from jax import lax
from jax.experimental import pallas as pl
from jax.experimental.pallas import tpu as pltpu

_EPS = 1e-8            # matches torch.nn.functional.cosine_similarity default
_EPS2 = _EPS * _EPS    # clamp applied to squared norms (sqrt is monotonic)

_LANE = 128
_MAX_LANE_TILE = 1024                  # lane tile, multiple of 128
_IN_BLOCK_BUDGET = 6 * 1024 * 1024     # per-input VMEM block budget (sublane-padded bytes)
_CHUNK_BUDGET = 512 * 1024             # per in-kernel batch-chunk f32 slab budget


def _cdiv(a, b):
    return -(-a // b)


def _round_up(v, m):
    return _cdiv(v, m) * m


def _sublane_multiple(itemsize):
    # sublane packing: 8 rows for 4-byte, 16 for 2-byte, 32 for 1-byte dtypes
    return {4: 8, 2: 16, 1: 32}.get(int(itemsize), 8)


def _vmem_cap_bytes():
    """Safe scoped-VMEM cap derived from physical VMEM (robust fallback)."""
    try:
        phys = int(pltpu.get_tpu_info().vmem_capacity_bytes)
    except Exception:
        phys = 64 << 20   # conservative: assume v7x (64 MiB / TensorCore)
    return int(min(64 << 20, max(16 << 20, phys * 3 // 4)))


def _cos_partial_kernel(x_ref, y_ref, out_ref, *, n, hw, b_tile, bb, t_hw,
                        need_row_mask, need_col_mask):
    """Per-(batch-tile, hw-tile) partial sums of cos_sim over the channel axis.

    x_ref / y_ref: (b_tile, C, t_hw) VMEM blocks.
    out_ref:       (b_tile, out_lanes) VMEM block of lane-group partial sums.
    """
    i = pl.program_id(0)
    j = pl.program_id(1)
    out_lanes = min(_LANE, t_hw)
    n_groups = max(1, t_hw // _LANE)
    n_chunks = b_tile // bb

    def process(off):
        # Cast to f32 BEFORE the multiplies (bf16/fp16 correctness, v5e VPU).
        x = x_ref[pl.ds(off, bb), :, :].astype(jnp.float32)
        y = y_ref[pl.ds(off, bb), :, :].astype(jnp.float32)

        # Channel (dim=1) reductions over the sublane axis.
        dot = jnp.sum(x * y, axis=1)                 # (bb, t_hw)
        nx2 = jnp.sum(x * x, axis=1)                 # (bb, t_hw)
        ny2 = jnp.sum(y * y, axis=1)                 # (bb, t_hw)

        # cos = dot / (max(||x||,eps)*max(||y||,eps)); rsqrt runs on the EUP.
        inv = lax.rsqrt(jnp.maximum(nx2, _EPS2)) * lax.rsqrt(jnp.maximum(ny2, _EPS2))
        cos = dot * inv                              # (bb, t_hw)

        # Mask ragged batch / spatial tails (only emitted when needed).
        if need_row_mask or need_col_mask:
            valid = None
            if need_row_mask:
                rows = i * b_tile + off + lax.broadcasted_iota(
                    jnp.int32, (bb, t_hw), 0)
                valid = rows < n
            if need_col_mask:
                cols = j * t_hw + lax.broadcasted_iota(
                    jnp.int32, (bb, t_hw), 1)
                cmask = cols < hw
                valid = cmask if valid is None else (valid & cmask)
            cos = jnp.where(valid, cos, 0.0)

        # Fold 128-lane groups with cheap, vreg-aligned VPU adds; the final
        # cross-lane/cross-tile reduction happens once, in the wrapper.
        part = cos[:, 0:out_lanes]
        for g in range(1, n_groups):                 # static, small unroll
            part = part + cos[:, g * _LANE:(g + 1) * _LANE]

        out_ref[pl.ds(off, bb), :] = part            # (bb, out_lanes)

    if n_chunks == 1:
        process(0)
    else:
        def body(t, carry):
            process(pl.multiple_of(t * bb, bb))
            return carry
        lax.fori_loop(0, n_chunks, body, 0, unroll=(n_chunks <= 8))


@jax.jit
def _cos_sim_mean_single(e_s, e_d):
    """mean(cosine_similarity(e_s, e_d, dim=1)) for same-shaped arrays."""
    assert e_s.shape == e_d.shape, "inputs must have identical shapes"
    assert e_s.ndim >= 2, "need at least (N, C) shaped inputs"

    n, c = e_s.shape[0], e_s.shape[1]
    hw = int(math.prod(e_s.shape[2:]))  # 1 if ndim == 2

    x = e_s.reshape(n, c, hw)
    y = e_d.reshape(n, c, hw)
    itemsize = int(x.dtype.itemsize)
    c_pad = _round_up(c, _sublane_multiple(itemsize))   # real sublane footprint

    # Lane tile: multiple of 128 that never exceeds hw (so any padded block is
    # a standard trailing partial block), capped at 1024 and by the per-block
    # VMEM budget for very large C.  If hw < 128, use the full dim.
    if hw >= _LANE:
        t_hw = min((hw // _LANE) * _LANE, _MAX_LANE_TILE)
        max_t = max(_LANE, (_IN_BLOCK_BUDGET // (c_pad * itemsize)) // _LANE * _LANE)
        t_hw = min(t_hw, max_t)
    else:
        t_hw = hw
    grid_hw = _cdiv(hw, t_hw)
    out_lanes = min(_LANE, t_hw)

    # Batch tile: biggest that fits the (sublane-padded) VMEM block budget,
    # minimal padding for that step count, and >= 2 grid blocks when possible
    # so both TensorCores on v7x get work.
    row_bytes = c_pad * t_hw * itemsize
    row_f32 = c_pad * t_hw * 4
    max_b = max(1, _IN_BLOCK_BUDGET // row_bytes)
    grid_b_min = 2 if (grid_hw == 1 and n >= 2) else 1
    desired_grid_b = max(_cdiv(n, max_b), grid_b_min)
    b_tile0 = _cdiv(n, desired_grid_b)

    # In-kernel batch-row chunk: keeps f32 temporaries bounded (~0.5 MiB slabs).
    bb = max(1, min(b_tile0, max(1, _CHUNK_BUDGET // row_f32)))
    b_tile = _round_up(b_tile0, bb)
    grid_b = _cdiv(n, b_tile)

    need_row_mask = (grid_b * b_tile != n)
    need_col_mask = (grid_hw * t_hw != hw)

    # Explicit scoped-VMEM limit: double-buffered (padded) input blocks +
    # per-chunk f32 temps + double-buffered output blocks + headroom, clamped
    # to a physical-VMEM-derived cap (safe on v5e/v6e/v7x).
    block_vmem = b_tile * row_bytes
    chunk_f32 = bb * row_f32
    out_block = b_tile * out_lanes * 4
    vmem_needed = 4 * block_vmem + 6 * chunk_f32 + 2 * out_block + (4 << 20)
    vmem_limit = int(min(_vmem_cap_bytes(), max(16 << 20, vmem_needed)))

    kernel = functools.partial(
        _cos_partial_kernel, n=n, hw=hw, b_tile=b_tile, bb=bb, t_hw=t_hw,
        need_row_mask=need_row_mask, need_col_mask=need_col_mask)

    in_spec = pl.BlockSpec((b_tile, c, t_hw), lambda i, j: (i, 0, j))
    out_spec = pl.BlockSpec((None, None, b_tile, out_lanes),
                            lambda i, j: (i, j, 0, 0))

    parts = pl.pallas_call(
        kernel,
        out_shape=jax.ShapeDtypeStruct((grid_b, grid_hw, b_tile, out_lanes),
                                       jnp.float32),
        grid=(grid_b, grid_hw),
        in_specs=[in_spec, in_spec],
        out_specs=out_spec,
        compiler_params=pltpu.CompilerParams(
            dimension_semantics=("parallel", "parallel"),  # megacore-friendly
            vmem_limit_bytes=vmem_limit,
        ),
    )(x, y)

    # Tiny final reduction + mean in the wrapper (padded positions are 0).
    return jnp.sum(parts) / jnp.float32(n * hw)


def cosine_similarity_loss(e_s, e_d):
    """Pallas port of MegaPortraits CosineSimilarityLoss.forward."""
    if isinstance(e_s, tuple) and isinstance(e_d, tuple):
        cos_sim = jnp.float32(0.0)
        for tensor_s, tensor_d in zip(e_s, e_d):
            cos_sim = cos_sim + _cos_sim_mean_single(tensor_s, tensor_d)
        return -cos_sim / len(e_s)
    else:
        return -_cos_sim_mean_single(e_s, e_d)


def _reference_loss(e_s, e_d):
    """Pure-JAX reference for verification."""
    def one(a, b):
        a = a.astype(jnp.float32)
        b = b.astype(jnp.float32)
        dot = jnp.sum(a * b, axis=1)
        na = jnp.sqrt(jnp.sum(a * a, axis=1))
        nb = jnp.sqrt(jnp.sum(b * b, axis=1))
        cos = dot / (jnp.maximum(na, _EPS) * jnp.maximum(nb, _EPS))
        return jnp.mean(cos)

    if isinstance(e_s, tuple):
        acc = 0.0
        for a, b in zip(e_s, e_d):
            acc += one(a, b)
        return -acc / len(e_s)
    return -one(e_s, e_d)


if __name__ == "__main__":
    key = jax.random.PRNGKey(0)
    k1, k2, k3, k4, k5, k6 = jax.random.split(key, 6)

    # Single-tensor case: NCHW = (2, 4, 16, 16).
    e_s = jax.random.normal(k1, (2, 4, 16, 16), dtype=jnp.float32)
    e_d = jax.random.normal(k2, (2, 4, 16, 16), dtype=jnp.float32)
    loss = cosine_similarity_loss(e_s, e_d)
    jax.block_until_ready(loss)
    ref = _reference_loss(e_s, e_d)
    assert jnp.allclose(loss, ref, atol=2e-5, rtol=2e-5), (loss, ref)

    # Tuple case (multi-scale embeddings); hw=64 < 128 exercises full-dim lane tile.
    e_s_t = (e_s, jax.random.normal(k3, (2, 8, 8, 8), dtype=jnp.float32))
    e_d_t = (e_d, jax.random.normal(k4, (2, 8, 8, 8), dtype=jnp.float32))
    loss_t = cosine_similarity_loss(e_s_t, e_d_t)
    jax.block_until_ready(loss_t)
    ref_t = _reference_loss(e_s_t, e_d_t)
    assert jnp.allclose(loss_t, ref_t, atol=2e-5, rtol=2e-5), (loss_t, ref_t)

    # Larger case: exercises the 1024-wide lane tile, the in-kernel chunked
    # fori_loop path and batch-tail masking (48 rows -> 2 blocks of 32).
    e_s_l = jax.random.normal(k5, (48, 8, 32, 32), dtype=jnp.float32)
    e_d_l = jax.random.normal(k6, (48, 8, 32, 32), dtype=jnp.float32)
    loss_l = cosine_similarity_loss(e_s_l, e_d_l)
    jax.block_until_ready(loss_l)
    ref_l = _reference_loss(e_s_l, e_d_l)
    assert jnp.allclose(loss_l, ref_l, atol=2e-5, rtol=2e-5), (loss_l, ref_l)

    print("KERNEL_OK")
</pallas_src>

<mosaic_0001>
module attributes {stable_mosaic.version = 11 : i64} {
  func.func @_cos_partial_kernel(%arg0: i32, %arg1: i32, %arg2: memref<1x4x256xf32, #tpu.memory_space<vmem>>, %arg3: memref<1x4x256xf32, #tpu.memory_space<vmem>>, %arg4: memref<1x1x1x128xf32, #tpu.memory_space<vmem>>) attributes {dimension_semantics = [#tpu.dimension_semantics<parallel>, #tpu.dimension_semantics<parallel>], iteration_bounds = array<i64: 2, 1>, scalar_prefetch = 0 : i64, scratch_operands = 0 : i64, tpu.core_type = #tpu.core_type<tc>, window_params = [{transform_indices = @transform_0, window_bounds = array<i64: 1, 4, 256>}, {transform_indices = @transform_1, window_bounds = array<i64: 1, 4, 256>}, {transform_indices = @transform_2, window_bounds = array<i64: 1, 1, 1, 128>}]} {
    %c0 = arith.constant 0 : index
    %c0_0 = arith.constant 0 : index
    %c0_1 = arith.constant 0 : index
    %0 = vector.load %arg2[%c0, %c0_0, %c0_1] : memref<1x4x256xf32, #tpu.memory_space<vmem>>, vector<1x4x256xf32>
    %c0_2 = arith.constant 0 : index
    %c0_3 = arith.constant 0 : index
    %c0_4 = arith.constant 0 : index
    %1 = vector.load %arg3[%c0_2, %c0_3, %c0_4] : memref<1x4x256xf32, #tpu.memory_space<vmem>>, vector<1x4x256xf32>
    %2 = arith.mulf %0, %1 : vector<1x4x256xf32>
    %cst = arith.constant dense<0.000000e+00> : vector<1x256xf32>
    %3 = vector.multi_reduction <add>, %2, %cst [1] : vector<1x4x256xf32> to vector<1x256xf32>
    %4 = arith.mulf %0, %0 : vector<1x4x256xf32>
    %cst_5 = arith.constant dense<0.000000e+00> : vector<1x256xf32>
    %5 = vector.multi_reduction <add>, %4, %cst_5 [1] : vector<1x4x256xf32> to vector<1x256xf32>
    %6 = arith.mulf %1, %1 : vector<1x4x256xf32>
    %cst_6 = arith.constant dense<0.000000e+00> : vector<1x256xf32>
    %7 = vector.multi_reduction <add>, %6, %cst_6 [1] : vector<1x4x256xf32> to vector<1x256xf32>
    %cst_7 = arith.constant 1.000000e-16 : f32
    %8 = vector.broadcast %cst_7 : f32 to vector<1x256xf32>
    %9 = arith.maximumf %5, %8 : vector<1x256xf32>
    %10 = math.rsqrt %9 : vector<1x256xf32>
    %cst_8 = arith.constant 1.000000e-16 : f32
    %11 = vector.broadcast %cst_8 : f32 to vector<1x256xf32>
    %12 = arith.maximumf %7, %11 : vector<1x256xf32>
    %13 = math.rsqrt %12 : vector<1x256xf32>
    %14 = arith.mulf %10, %13 : vector<1x256xf32>
    %15 = arith.mulf %3, %14 : vector<1x256xf32>
    %16 = vector.extract_strided_slice %15 {offsets = [0, 0], sizes = [1, 128], strides = [1, 1]} : vector<1x256xf32> to vector<1x128xf32>
    %17 = vector.extract_strided_slice %15 {offsets = [0, 128], sizes = [1, 128], strides = [1, 1]} : vector<1x256xf32> to vector<1x128xf32>
    %18 = arith.addf %16, %17 : vector<1x128xf32>
    %c0_9 = arith.constant 0 : index
    %c0_10 = arith.constant 0 : index
    %c0_11 = arith.constant 0 : index
    %c0_12 = arith.constant 0 : index
    %19 = vector.load %arg4[%c0_9, %c0_10, %c0_11, %c0_12] : memref<1x1x1x128xf32, #tpu.memory_space<vmem>>, vector<1x1x1x128xf32>
    %20 = vector.shape_cast %19 : vector<1x1x1x128xf32> to vector<1x128xf32>
    %21 = vector.shape_cast %18 : vector<1x128xf32> to vector<1x1x1x128xf32>
    tpu.vector_store %arg4[%c0_9, %c0_10, %c0_11, %c0_12], %21 {strides = array<i32>} : memref<1x1x1x128xf32, #tpu.memory_space<vmem>>, vector<1x1x1x128xf32>,
    return
  }
  func.func @transform_0(%arg0: i32, %arg1: i32) -> (i32, i32, i32) {
    %c0_i32 = arith.constant 0 : i32
    %c0_i32_0 = arith.constant 0 : i32
    return %arg0, %c0_i32, %arg1 : i32, i32, i32
  }
  func.func @transform_1(%arg0: i32, %arg1: i32) -> (i32, i32, i32) {
    %c0_i32 = arith.constant 0 : i32
    %c0_i32_0 = arith.constant 0 : i32
    return %arg0, %c0_i32, %arg1 : i32, i32, i32
  }
  func.func @transform_2(%arg0: i32, %arg1: i32) -> (i32, i32, i32, i32) {
    %c0_i32 = arith.constant 0 : i32
    %c0_i32_0 = arith.constant 0 : i32
    %c0_i32_1 = arith.constant 0 : i32
    return %arg0, %arg1, %c0_i32, %c0_i32_0 : i32, i32, i32, i32
  }
}

</mosaic_0001>

<bundles_post_ra>
// kernel: _cos_sim_mean_single.1
= control target key start
LH: loop header
LB: loop body
LE: loop exit
PB: predicated region body
PF: predicated region fallthrough
CT: control target
= control target key end

     0   :  { %s456_s9 = smov 0   ;;  %s458_s10 = smov 0   ;;  %s502_s0 = inlined_call_operand.vmem [shape: f32[2,4,256], index: 0, kind: input, shape index: {}]   ;;  %s503_s1 = inlined_call_operand.vmem [shape: f32[2,4,256], index: 1, kind: input, shape index: {}]   ;;  %s504_s2 = inlined_call_operand.vmem [shape: f32[2,1,1,128], index: 2, kind: output, shape index: {}]  }
   0x1   :  { %s460_s11 = smov 0  }
   0x2 LB: > { %s24_s12 = sadd.s32 1, %s435_s10  ;;  %p376_p0 = scmp.ge.s32.totalorder %s439_s11, 1  ;;  %s439_s11 = sphi %s460_s11, %s12_s11   ;;  %s435_s10 = sphi %s458_s10, %s506_s10   ;;  %s431_s9 = sphi %s456_s9, %s505_s9  }
   0x3   : > { %p26_p1 = scmp.ge.s32.totalorder %s24_s12, 2  ;;  %p150_p2 = scmp.lt.s32.totalorder %s439_s11, 3 }
   0x5   : > { %s508_s12 = smov (%p26_p1, %s24_s12), 0  ;;  %p151_p3 = pnand %p376_p0, %p150_p2 }
   0x6   : > { %p187_p4 = scmp.lt.s32.totalorder (!%p151_p3), %s431_s9, 1  ;;  %vm218_vm0 = vcmask (!%p151_p3), 1043456  }
   0x7   : > { %154 = sbr.rel (%p151_p3) target bundleno = 56 (0x38), region = 28 }
   0xe   : > { %s510_s9 = smov (!%p187_p4, %s431_s9), 1 }
   0xf   : > { %s383_s13 = sshll.u32 %s510_s9, 3  ;;  %s211_s22 = scalar_lea.vmem %s504_s2, %s510_s9 }
  0x10   : > { %s194_s16 = scalar_lea.vmem %s502_s0, %s383_s13  ;;  %s204_s19 = scalar_lea.vmem %s503_s1, %s383_s13 }
  0x11   : > { %v212_v0 = vld [vmem:[%s194_s16] sm:$0xff] }
  0x12   : > { %v213_v1 = vld [vmem:[%s204_s19] sm:$0xff]  ;;  %v233_v3 = vmul.f32 %v212_v0, %v212_v0 }
  0x13   : > { %v214_v2 = vmul.f32 %v213_v1, %v212_v0  ;;  %v251_v4 = vmul.f32 %v213_v1, %v213_v1 }
  0x14   : > { %v235_v5 = vcombine.high %v233_v3, %v233_v3  ;;  %v237_v6 = vsel %vm218_vm0, %v233_v3, 0.0 }
  0x15   : > { %v238_v7 = vrot.slane %v237_v6, 4  ;;  %v253_v8 = vcombine.high %v251_v4, %v251_v4  ;;  %v255_v9 = vsel %vm218_vm0, %v251_v4, 0.0  ;;  %v216_v10 = vcombine.high %v214_v2, %v214_v2 }
  0x16   : > { %v244_v11 = vsel %vm218_vm0, %v235_v5, 0.0  ;;  %v256_v12 = vrot.slane %v255_v9, 4  ;;  %v219_v15 = vsel %vm218_vm0, %v214_v2, 0.0 }
  0x17   : > { %v239_v13 = vadd.f32 %v238_v7, %v237_v6  ;;  %v245_v14 = vrot.slane %v244_v11, 4  ;;  %v262_v17 = vsel %vm218_vm0, %v253_v8, 0.0  ;;  %v226_v20 = vsel %vm218_vm0, %v216_v10, 0.0 }
  0x18   : > { %v257_v16 = vadd.f32 %v256_v12, %v255_v9  ;;  %v263_v22 = vrot.slane %v262_v17, 4  ;;  %v220_v23 = vrot.slane %v219_v15, 4  ;;  %v227_v28 = vrot.slane %v226_v20, 4 }
  0x19   : > { %v240_v18 = vrot.slane %v239_v13, 2  ;;  %v246_v19 = vadd.f32 %v245_v14, %v244_v11 }
  0x1a   : > { %v258_v21 = vrot.slane %v257_v16, 2  ;;  %v264_v27 = vadd.f32 %v263_v22, %v262_v17  ;;  %v221_v33 = vadd.f32 %v220_v23, %v219_v15  ;;  %v228_v38 = vadd.f32 %v227_v28, %v226_v20 }
  0x1b   : > { %v241_v24 = vadd.f32 %v240_v18, %v239_v13  ;;  %v247_v25 = vrot.slane %v246_v19, 2 }
  0x1c   : > { %v259_v26 = vadd.f32 %v258_v21, %v257_v16  ;;  %v265_v32 = vrot.slane %v264_v27, 2  ;;  %v222_v43 = vrot.slane %v221_v33, 2  ;;  %v229_v46 = vrot.slane %v228_v38, 2 }
  0x1d   : > { %v242_v29 = vrot.slane %v241_v24, 1  ;;  %v248_v30 = vadd.f32 %v247_v25, %v246_v19 }
  0x1e   : > { %v260_v31 = vrot.slane %v259_v26, 1  ;;  %v266_v37 = vadd.f32 %v265_v32, %v264_v27  ;;  %v223_v48 = vadd.f32 %v222_v43, %v221_v33  ;;  %v230_v49 = vadd.f32 %v229_v46, %v228_v38 }
  0x1f   : > { %v243_v34 = vadd.f32 %v242_v29, %v241_v24  ;;  %v249_v35 = vrot.slane %v248_v30, 1 }
  0x20   : > { %v261_v36 = vadd.f32 %v260_v31, %v259_v26  ;;  %v267_v41 = vrot.slane %v266_v37, 1  ;;  %v224_v50 = vrot.slane %v223_v48, 1  ;;  %v231_v52 = vrot.slane %v230_v49, 1 }
  0x21   : > { %v250_v39 = vadd.f32 %v249_v35, %v248_v30  ;;  %v269_v40 = vmax.f32 %v243_v34, 1e-16 }
  0x22   : > { %v273_v42 = vmax.f32 %v261_v36, 1e-16  ;;  %v268_v45 = vadd.f32 %v267_v41, %v266_v37  ;;  %v225_v54 = vadd.f32 %v224_v50, %v223_v48  ;;  %v232_v57 = vadd.f32 %v231_v52, %v230_v49 }
  0x23   : > { %v270_v44 = vmax.f32 %v250_v39, 1e-16  ;;  %409 = vrsqrt.f32 %v269_v40 }
  0x24   : > { %411 = vrsqrt.f32 %v273_v42  ;;  %v274_v47 = vmax.f32 %v268_v45, 1e-16 }
  0x25   : > { %413 = vrsqrt.f32 %v270_v44 }
  0x26   : > { %415 = vrsqrt.f32 %v274_v47 }
  0x2d   : > { %v410_v51 = vpop.eup %409 }
  0x2e   : > { %v412_v53 = vpop.eup %411 }
  0x2f   : > { %v277_v55 = vmul.f32 %v412_v53, %v410_v51  ;;  %v414_v56 = vpop.eup %413 }
  0x30   : > { %v416_v58 = vpop.eup %415 }
  0x31   : > { %v278_v59 = vmul.f32 %v416_v58, %v414_v56  ;;  %v279_v60 = vmul.f32 %v277_v55, %v225_v54 }
  0x33   : > { %v280_v61 = vmul.f32 %v278_v59, %v232_v57 }
  0x35   : > { %v281_v62 = vadd.f32 %v280_v61, %v279_v60 }
  0x37   : > { %282 = vst [vmem:[%s211_s22] sm:$0x1] %v281_v62 }
  0x38 PF: > { %s12_s11 = sadd.s32 1, %s439_s11   ;;  %s505_s9 = smov %s435_s10 }
  0x39   : > { %p9_p5 = scmp.ge.s32.totalorder %s12_s11, 4   ;;  %s506_s10 = smov %s508_s12 }
  0x3b   :  { %11 = sbr.rel (!%p9_p5) target bundleno = 2 (0x2), region = 61 }

</bundles_post_ra>
